<compile_context>
chip_gen: v6e
topology: v6e:2x2x1
jax: 0.10.0
libtpu: 0.0.40
codegen_flags: <defaults>
</compile_context>

<pallas_src>
import functools

import jax
import jax.numpy as jnp
from jax.experimental import pallas as pl
from jax.experimental.pallas import tpu as pltpu


def _round_up(x, m):
    return ((x + m - 1) // m) * m


def _softmax_pool_kernel(v0_ref, v1_ref, o_ref, *, n_valid):
    # v0/v1: even/odd elements of each pool pair, (TM, TN) lane-dense tiles.
    v0 = v0_ref[...].astype(jnp.float32)
    v1 = v1_ref[...].astype(jnp.float32)
    tm, tn = v0.shape

    # Global pooled-column index of every lane in this tile.
    j = pl.program_id(1)
    col = j * tn + jax.lax.broadcasted_iota(jnp.int32, (tm, tn), 1)
    # The odd element of a pair is padding iff 2*col + 1 >= n; the reference
    # masks its logit to -finfo.max, i.e. exactly zero softmax weight.
    valid1 = (2 * col + 1) < n_valid

    # 2-element softmax: weight of element 1 == sigmoid(l1 - l0); pooled value
    # is then a lerp between v0 and v1 (logits == values in this module).
    w1 = jnp.where(valid1, 1.0 / (1.0 + jnp.exp(v0 - v1)), 0.0)
    out = v0 + (v1 - v0) * w1
    o_ref[...] = out.astype(o_ref.dtype)


def softmax_pool(x, pool_size=2):
    """JAX/Pallas equivalent of SoftmaxPool.forward. x: (b, d, n) -> (b, d, ceil(n/2))."""
    assert pool_size == 2, "module hard-codes p=2 in its Rearrange"
    b, d, n = x.shape
    half = (n + 1) // 2          # pooled length == ceil(n / 2)
    rows = b * d

    itemsize = jnp.dtype(x.dtype).itemsize
    sub = {4: 8, 2: 16, 1: 32}.get(itemsize, 8)

    # Lane-dense, generation-safe tile sizes (fits all of v5e/v6e/v7x VMEM).
    tm_blk = min(256, _round_up(rows, sub))
    tn_blk = min(1024, _round_up(half, 128))
    rows_pad = _round_up(rows, tm_blk)
    half_pad = _round_up(half, tn_blk)

    # --- wrapper glue: pad to even length and de-interleave the pool pairs ---
    n_even = 2 * half
    if n_even != n:
        x = jnp.pad(x, ((0, 0), (0, 0), (0, n_even - n)))   # pad value 0 (as in reference)
    pairs = x.reshape(rows, half, 2)
    v0 = pairs[..., 0]
    v1 = pairs[..., 1]
    if rows_pad != rows or half_pad != half:
        pad = ((0, rows_pad - rows), (0, half_pad - half))
        v0 = jnp.pad(v0, pad)
        v1 = jnp.pad(v1, pad)

    kernel = functools.partial(_softmax_pool_kernel, n_valid=n)
    blk = pl.BlockSpec((tm_blk, tn_blk), lambda i, j: (i, j))

    out = pl.pallas_call(
        kernel,
        out_shape=jax.ShapeDtypeStruct((rows_pad, half_pad), x.dtype),
        grid=(rows_pad // tm_blk, half_pad // tn_blk),
        in_specs=[blk, blk],
        out_specs=pl.BlockSpec((tm_blk, tn_blk), lambda i, j: (i, j)),
        compiler_params=pltpu.CompilerParams(
            dimension_semantics=("parallel", "parallel")),
    )(v0, v1)

    return out[:rows, :half].reshape(b, d, half)


def _reference_softmax_pool(x, pool_size=2):
    """Pure-JAX reference mirroring the PyTorch forward exactly."""
    b, d, n = x.shape
    remainder = n % pool_size
    if remainder > 0:
        x = jnp.pad(x, ((0, 0), (0, 0), (0, remainder)))
        logits = x.at[..., n:].set(-jnp.finfo(x.dtype).max)
    else:
        logits = x
    xr = x.reshape(b, d, -1, 2)
    lr = logits.reshape(b, d, -1, 2)
    attn = jax.nn.softmax(lr, axis=-1)
    return (xr * attn).sum(axis=-1)


if __name__ == "__main__":
    # Even-length case (typical use).
    b, d, n = 2, 4, 16
    x = jax.random.normal(jax.random.PRNGKey(0), (b, d, n), dtype=jnp.float32)
    out = jax.block_until_ready(softmax_pool(x))
    ref = _reference_softmax_pool(x)
    assert out.shape == (b, d, n // 2)
    assert jnp.allclose(out, ref, atol=1e-5, rtol=1e-5), "mismatch vs reference (even n)"

    # Odd-length case exercises the padded-logit mask path.
    n_odd = 15
    x_odd = jax.random.normal(jax.random.PRNGKey(1), (b, d, n_odd), dtype=jnp.float32)
    out_odd = jax.block_until_ready(softmax_pool(x_odd))
    ref_odd = _reference_softmax_pool(x_odd)
    assert out_odd.shape == (b, d, (n_odd + 1) // 2)
    assert jnp.allclose(out_odd, ref_odd, atol=1e-5, rtol=1e-5), "mismatch vs reference (odd n)"

    print("KERNEL_OK")
</pallas_src>

<mosaic_0001>
module attributes {stable_mosaic.version = 11 : i64} {
  func.func @_softmax_pool_kernel(%arg0: i32, %arg1: i32, %arg2: memref<8x128xf32, #tpu.memory_space<vmem>>, %arg3: memref<8x128xf32, #tpu.memory_space<vmem>>, %arg4: memref<8x128xf32, #tpu.memory_space<vmem>>) attributes {dimension_semantics = [#tpu.dimension_semantics<parallel>, #tpu.dimension_semantics<parallel>], iteration_bounds = array<i64: 1, 1>, scalar_prefetch = 0 : i64, scratch_operands = 0 : i64, tpu.core_type = #tpu.core_type<tc>, window_params = [{transform_indices = @transform_0, window_bounds = array<i64: 8, 128>}, {transform_indices = @transform_1, window_bounds = array<i64: 8, 128>}, {transform_indices = @transform_2, window_bounds = array<i64: 8, 128>}]} {
    %c0 = arith.constant 0 : index
    %c0_0 = arith.constant 0 : index
    %0 = vector.load %arg2[%c0, %c0_0] : memref<8x128xf32, #tpu.memory_space<vmem>>, vector<8x128xf32>
    %c0_1 = arith.constant 0 : index
    %c0_2 = arith.constant 0 : index
    %1 = vector.load %arg3[%c0_1, %c0_2] : memref<8x128xf32, #tpu.memory_space<vmem>>, vector<8x128xf32>
    %c128_i32 = arith.constant 128 : i32
    %2 = arith.muli %arg1, %c128_i32 : i32
    %3 = tpu.iota {dimensions = array<i32: 1>} : vector<8x128xi32>
    %4 = vector.broadcast %2 : i32 to vector<8x128xi32>
    %5 = arith.addi %4, %3 : vector<8x128xi32>
    %c2_i32 = arith.constant 2 : i32
    %6 = vector.broadcast %c2_i32 : i32 to vector<8x128xi32>
    %7 = arith.muli %6, %5 : vector<8x128xi32>
    %c1_i32 = arith.constant 1 : i32
    %8 = vector.broadcast %c1_i32 : i32 to vector<8x128xi32>
    %9 = arith.addi %7, %8 : vector<8x128xi32>
    %c16_i32 = arith.constant 16 : i32
    %10 = vector.broadcast %c16_i32 : i32 to vector<8x128xi32>
    %11 = arith.cmpi slt, %9, %10 : vector<8x128xi32>
    %12 = arith.subf %0, %1 : vector<8x128xf32>
    %13 = math.exp %12 : vector<8x128xf32>
    %cst = arith.constant 1.000000e+00 : f32
    %14 = vector.broadcast %cst : f32 to vector<8x128xf32>
    %15 = arith.addf %14, %13 : vector<8x128xf32>
    %cst_3 = arith.constant 1.000000e+00 : f32
    %16 = vector.broadcast %cst_3 : f32 to vector<8x128xf32>
    %17 = arith.divf %16, %15 : vector<8x128xf32>
    %cst_4 = arith.constant 0.000000e+00 : f32
    %18 = vector.broadcast %cst_4 : f32 to vector<8x128xf32>
    %19 = arith.select %11, %17, %18 : vector<8x128xi1>, vector<8x128xf32>
    %20 = arith.subf %1, %0 : vector<8x128xf32>
    %21 = arith.mulf %20, %19 : vector<8x128xf32>
    %22 = arith.addf %0, %21 : vector<8x128xf32>
    %c0_5 = arith.constant 0 : index
    %c0_6 = arith.constant 0 : index
    %23 = vector.load %arg4[%c0_5, %c0_6] : memref<8x128xf32, #tpu.memory_space<vmem>>, vector<8x128xf32>
    tpu.vector_store %arg4[%c0_5, %c0_6], %22 {strides = array<i32>} : memref<8x128xf32, #tpu.memory_space<vmem>>, vector<8x128xf32>,
    return
  }
  func.func @transform_0(%arg0: i32, %arg1: i32) -> (i32, i32) {
    %c0_i32 = arith.constant 0 : i32
    return %arg0, %arg1 : i32, i32
  }
  func.func @transform_1(%arg0: i32, %arg1: i32) -> (i32, i32) {
    %c0_i32 = arith.constant 0 : i32
    return %arg0, %arg1 : i32, i32
  }
  func.func @transform_2(%arg0: i32, %arg1: i32) -> (i32, i32) {
    %c0_i32 = arith.constant 0 : i32
    return %arg0, %arg1 : i32, i32
  }
}

</mosaic_0001>

<bundles_post_ra>
// kernel: tpu_custom_call.1
= control target key start
LH: loop header
LB: loop body
LE: loop exit
PB: predicated region body
PF: predicated region fallthrough
CT: control target
= control target key end

     0   :  { %7 = vsyncpa [#allocation3], 0  ;;  %s173_s0 = inlined_call_operand.hbm [shape: f32[8,128], index: 0, kind: input, shape index: {}]   ;;  %s174_s1 = inlined_call_operand.hbm [shape: f32[8,128], index: 1, kind: input, shape index: {}]   ;;  %s175_s2 = inlined_call_operand.hbm [shape: f32[8,128], index: 2, kind: output, shape index: {}]  }
   0x1   :  { %8 = vsyncpa [#allocation6], 0 }
   0x2   :  { %9 = vsyncpa [#allocation4], 0  ;;  %s146_s9 = smov [#allocation2]   ;;  %s147_s11 = smov [#allocation5]  }
   0x3   :  { %s16_s10 = sshll.u32 %s146_s9, 4  ;;  %s26_s12 = sshll.u32 %s147_s11, 4  ;;  %s17_s10 = int_to_ptr.vmem [resolvable:$true] %s16_s10  ;;  %s27_s12 = int_to_ptr.vmem [resolvable:$true] %s26_s12 }
   0x4   :  { %s88_s13 = scalar_lea.vmem %s17_s10, 128  ;;  %p93_p1 = scmp.lt.s32.totalorder %s17_s10, %s17_s10 }
   0x5   :  { %p89_p0 = scmp.ne.s32.totalorder %s17_s10, %s88_s13  ;;  %p94_p2 = scmp.lt.s32.totalorder %s88_s13, %s88_s13 }
   0x7   :  { %p95_p3 = por %p94_p2, %p93_p1 }
   0x9   :  { %p96_p4 = pnand %p95_p3, %p89_p0 }
   0xb   :  { %99 = shalt.err (!%p96_p4)
}
   0xc   :  { %19 = dma.hbm_to_vmem [thread:$0]  %s173_s0, 128, %s17_s10, [#allocation3]  }
   0xd   :  { %s108_s16 = scalar_lea.vmem %s27_s12, 128  ;;  %p113_p6 = scmp.lt.s32.totalorder %s27_s12, %s27_s12 }
   0xe   :  { %p109_p5 = scmp.ne.s32.totalorder %s27_s12, %s108_s16  ;;  %p114_p7 = scmp.lt.s32.totalorder %s108_s16, %s108_s16 }
  0x10   :  { %p115_p8 = por %p114_p7, %p113_p6 }
  0x12   :  { %p116_p9 = pnand %p115_p8, %p109_p5 }
  0x14   :  { %119 = shalt.err (!%p116_p9)
}
  0x15   :  { %29 = dma.hbm_to_vmem [thread:$0]  %s174_s1, 128, %s27_s12, [#allocation6]  }
  0x16   :  { %140 = dma.done.wait [#allocation3], 128  }
  0x17   :  { %141 = vsyncadd [#allocation3], 4294967168 }
  0x18   :  { %142 = dma.done.wait [#allocation6], 128  }
  0x19   :  { %143 = vsyncadd [#allocation6], 4294967168  ;;  %v36_v0 = vld [vmem:[#allocation2] sm:$0xff]  ;;  %v37_v1 = vld [vmem:[#allocation5] sm:$0xff]  ;;  %v39_v4 = vlaneseq  ;;  %s148_s0 = smov [#allocation7]  }
  0x1a   :  { %v46_v2 = vsub.f32 %v36_v0, %v37_v1  ;;  %v53_v10 = vsub.f32 %v37_v1, %v36_v0  ;;  %s63_s1 = sshll.u32 %s148_s0, 4  ;;  %s64_s1 = int_to_ptr.vmem [resolvable:$true] %s63_s1 }
  0x1b   :  { %v40_v7 = vand.u32 127, %v39_v4  ;;  %s120_s19 = scalar_lea.vmem %s64_s1, 128  ;;  %p125_p11 = scmp.lt.s32.totalorder %s64_s1, %s64_s1 }
  0x1c   :  { %v47_v3 = vmul.f32 1.442695, %v46_v2  ;;  %p121_p10 = scmp.ne.s32.totalorder %s64_s1, %s120_s19  ;;  %p126_p12 = scmp.lt.s32.totalorder %s120_s19, %s120_s19 }
  0x1d   :  { %v43_v8 = vmul.u32 2, %v40_v7 }
  0x1e   :  { %76 = vpow2.f32 %v47_v3  ;;  %p127_p13 = por %p126_p12, %p125_p11 }
  0x1f   :  { %v44_v9 = vadd.s32 1, %v43_v8 }
  0x20   :  { %p128_p0 = pnand %p127_p13, %p121_p10 }
  0x21   :  { %vm45_vm0 = vcmp.lt.s32.totalorder %v44_v9, 16 }
  0x2b   :  { %v77_v5 = vpop.eup %76 }
  0x2c   :  { %v49_v6 = vadd.f32 1.0, %v77_v5 }
  0x2e   :  { %78 = vrcp.f32 %v49_v6 }
  0x3b   :  { %v79_v11 = vpop.eup %78 }
  0x3c   :  { %v52_v12 = vsel %vm45_vm0, %v79_v11, 0.0 }
  0x3d   :  { %v54_v13 = vmul.f32 %v53_v10, %v52_v12 }
  0x3f   :  { %v55_v14 = vadd.f32 %v54_v13, %v36_v0 }
  0x41   :  { %56 = vst [vmem:[#allocation7] sm:$0xff] %v55_v14 }
  0x42   :  { %131 = shalt.err (!%p128_p0)
}
  0x43   :  { %66 = dma.vmem_to_hbm [thread:$0]  %s64_s1, 128, %s175_s2, [#allocation4]  }
  0x44   :  { %144 = dma.done.wait [#allocation4], 128  }
  0x45   :  { %145 = vsyncadd [#allocation4], 4294967168 }
  0x46   :  { %70 = vsyncpa [#allocation3], 1 }
  0x47   :  { %71 = vsyncpa [#allocation6], 1 }
  0x48   :  { %72 = vsyncpa [#allocation4], 1 }

</bundles_post_ra>
